<compile_context>
chip_gen: v5e
topology: v5e:2x2
jax: 0.10.0
libtpu: 0.0.40
codegen_flags: <defaults>
</compile_context>

<pallas_src>
import functools

import jax
import jax.numpy as jnp
import numpy as np
from jax.experimental import pallas as pl
from jax.experimental.pallas import tpu as pltpu


def _round_up(x, m):
    return (x + m - 1) // m * m


def _make_luong_kernel(s_valid, d_chunk):
    """Kernel factory; closes over the number of real sequence positions."""

    def kernel(hid_ref, lens_ref, enc_ref, w_ref, b_ref, out_ref):
        # hid_ref : [tb, E2]         f32  hidden repeated to encoder width
        # lens_ref: [tb, 1]          i32  valid length per row (prefix mask)
        # enc_ref : [tb, E2, S_pad]  bf16 encoder outputs, S on the lane dim
        # w_ref   : [E2, E2]         f32  attn.weight (VMEM resident)
        # b_ref   : [1, E2]          f32  attn.bias   (VMEM resident)
        # out_ref : [tb, S_pad]           softmax over S
        tb, e2, s_pad = enc_ref.shape

        # Fold the attn Linear onto the tiny hidden state once per batch tile.
        q = jnp.dot(hid_ref[...], w_ref[...],
                    preferred_element_type=jnp.float32)                  # [tb, E2]
        c = jnp.sum(hid_ref[...] * b_ref[...], axis=-1, keepdims=True)   # [tb, 1]

        # score[b, s] = sum_d q[b, d] * enc[b, d, s]
        # S_pad sits on the lane dim (lane-dense); the E2 contraction is a
        # cheap sublane reduce.  enc is upcast to f32 chunk-wise so the
        # streamed bf16 tile never gets a full-size f32 copy in VMEM.
        score = None
        for d0 in range(0, e2, d_chunk):
            dl = min(d_chunk, e2 - d0)
            chunk = enc_ref[:, d0:d0 + dl, :].astype(jnp.float32)        # [tb, dl, S_pad]
            part = jnp.sum(chunk * q[:, d0:d0 + dl, None], axis=1)       # [tb, S_pad]
            score = part if score is None else score + part
        score = score + c

        # Rebuild the (prefix) mask in-kernel from lens: no [B, S] mask stream.
        col = jax.lax.broadcasted_iota(jnp.int32, (tb, s_pad), 1)
        score = jnp.where(col < lens_ref[...], score, jnp.float32(-1e10))

        # Softmax over S in f32.  Padded S columns are excluded from the
        # normalization so a fully-masked row matches PyTorch (uniform over
        # the S real positions, not over S_pad).
        m = jnp.max(score, axis=-1, keepdims=True)
        e = jnp.exp(score - m)
        e = jnp.where(col < s_valid, e, 0.0)
        denom = jnp.sum(e, axis=-1, keepdims=True)
        r = pl.reciprocal(denom, approx=True)      # EUP slot (free-ish)
        r = r * (2.0 - denom * r)                  # one Newton step -> ~f32 exact
        out_ref[...] = (e * r).astype(out_ref.dtype)

    return kernel


def luong_global_attention(hidden, encoder_outputs, mask=None, params=None, *,
                           lens=None, method='general', bidirectional=True,
                           enc_layout='sbe', enc_compute_dtype=jnp.bfloat16,
                           out_dtype=jnp.float32, target_block_bytes=1 << 20):
    """hidden [1,B,D], encoder_outputs [S,B,E2] ('sbe') or [B,E2,S] ('bes'),
    mask [B,S] padding mask (or lens [B] directly) -> attention weights [B,1,S]."""
    if enc_layout == 'sbe':
        S, B, E2 = encoder_outputs.shape
    elif enc_layout == 'bes':
        B, E2, S = encoder_outputs.shape
    else:
        raise ValueError(enc_layout)

    D = hidden.shape[-1]
    rep = 2 if bidirectional else 1
    assert rep * D == E2, "hidden.repeat width must match encoder feature width"

    if method == 'general':
        w = params['attn_w'].astype(jnp.float32)       # nn.Linear weight [E2, E2]
        b = params['attn_b'].astype(jnp.float32)       # [E2]
    elif method == 'dot':
        w = jnp.eye(E2, dtype=jnp.float32)
        b = jnp.zeros((E2,), jnp.float32)
    else:
        # TODO(synk): METHOD == 'concat' (additive tanh(W[h;enc])·v) needs a
        # separate kernel and is not implemented here.
        raise NotImplementedError("METHOD='concat' not implemented as a Pallas kernel")

    # Per-row valid lengths: the standard seq2seq mask is mask[b,s] = (s < len_b);
    # only lens is streamed and the mask is rebuilt in-kernel (iota compare),
    # removing the [B,S] int mask HBM stream entirely.
    # TODO(synk): arbitrary non-prefix masks would need a streamed-mask kernel
    # variant; not required for this module's padded-sequence use.
    if lens is None:
        lens = jnp.sum(mask != 0, axis=1)
    lens = jnp.clip(jnp.asarray(lens).reshape(B).astype(jnp.int32), 0, S)
    lens2d = lens.reshape(B, 1)

    h_rep = jnp.tile(hidden[0].astype(jnp.float32), (1, rep))            # [B, E2]

    # Encoder laid out [B, E2, S]: the padded S axis lands on the lane dim
    # inside the kernel.  Transpose + bf16 cast + pad fuse into one HBM pass
    # under jit; ideally the encoder emits [B, E2, S] bf16 directly ('bes').
    if enc_layout == 'sbe':
        enc = jnp.transpose(encoder_outputs, (1, 2, 0)).astype(enc_compute_dtype)
    else:
        enc = encoder_outputs.astype(enc_compute_dtype)                  # [B, E2, S]

    enc_itemsize = jnp.dtype(enc_compute_dtype).itemsize
    S_pad = _round_up(S, 128)                      # lane-dense output stores
    bytes_per_row = S_pad * E2 * enc_itemsize

    # Tile sizing: ~1 MiB enc blocks (fits v7x's 64 MiB VMEM comfortably; fine
    # on v5e/v6e), but never fewer than 2 grid steps when the batch allows it
    # so both of v7x's TensorCores get work.
    tile_b_target = max(8, (target_block_bytes // bytes_per_row) // 8 * 8)
    b8 = _round_up(B, 8)
    half_b = _round_up(-(-b8 // 2), 8)
    tile_b = max(8, min(tile_b_target, half_b))
    B_pad = _round_up(B, tile_b)
    grid = (B_pad // tile_b,)
    # TODO(synk): for very long S (or tiny B on v7x) add an S grid axis with a
    # two-pass / online softmax so the enc block stays bounded.

    d_chunk = 16 if E2 % 16 == 0 else (8 if E2 % 8 == 0 else E2)

    h_rep = jnp.pad(h_rep, ((0, B_pad - B), (0, 0)))
    lens2d = jnp.pad(lens2d, ((0, B_pad - B), (0, 0)))   # padded rows: lens = 0
    enc = jnp.pad(enc, ((0, B_pad - B), (0, 0), (0, S_pad - S)))
    b2d = b.reshape(1, E2)

    # VMEM budget: double-buffered streamed tiles + resident weights + bounded
    # in-kernel temps + headroom; capped at 32 MiB (inside v7x's 64 MiB).
    enc_blk = tile_b * E2 * S_pad * enc_itemsize
    io_blk = (enc_blk + tile_b * E2 * 4 + tile_b * 4
              + tile_b * S_pad * jnp.dtype(out_dtype).itemsize)
    resident = 2 * (E2 * E2 + E2) * 4
    temps = tile_b * d_chunk * S_pad * 4 + 6 * tile_b * S_pad * 4
    vmem_limit = int(min(max(2 * io_blk + resident + temps + (6 << 20), 12 << 20),
                         32 << 20))

    out = pl.pallas_call(
        _make_luong_kernel(S, d_chunk),
        out_shape=jax.ShapeDtypeStruct((B_pad, S_pad), out_dtype),
        grid_spec=pltpu.PrefetchScalarGridSpec(
            num_scalar_prefetch=0,
            grid=grid,
            in_specs=[
                pl.BlockSpec((tile_b, E2), lambda i: (i, 0)),            # hidden
                pl.BlockSpec((tile_b, 1), lambda i: (i, 0)),             # lens
                pl.BlockSpec((tile_b, E2, S_pad), lambda i: (i, 0, 0)),  # enc (streamed)
                pl.BlockSpec((E2, E2), lambda i: (0, 0)),                # W (resident)
                pl.BlockSpec((1, E2), lambda i: (0, 0)),                 # bias (resident)
            ],
            out_specs=pl.BlockSpec((tile_b, S_pad), lambda i: (i, 0)),
        ),
        compiler_params=pltpu.CompilerParams(
            dimension_semantics=("parallel",),     # batch tiles shard across TCs
            vmem_limit_bytes=vmem_limit,
        ),
    )(h_rep, lens2d, enc, w, b2d)

    return out[:B, :S].astype(jnp.float32)[:, None, :]     # [B, 1, S]


def luong_reference(hidden, encoder_outputs, mask, params, method='general',
                    bidirectional=True):
    """Pure-JAX transliteration of the PyTorch forward (for verification)."""
    rep = 2 if bidirectional else 1
    h_rep = jnp.tile(hidden, (1, 1, rep))                                   # [1, B, E2]
    if method == 'general':
        energy = encoder_outputs @ params['attn_w'].T + params['attn_b']    # [S, B, E2]
        attn = jnp.sum(h_rep * energy, axis=2)                              # [S, B]
    elif method == 'dot':
        attn = jnp.sum(h_rep * encoder_outputs, axis=2)                     # [S, B]
    else:
        raise NotImplementedError(method)
    attn = attn.T                                                           # [B, S]
    attn = jnp.where(mask == 0, jnp.float32(-1e10), attn)
    return jax.nn.softmax(attn, axis=1)[:, None, :]                         # [B, 1, S]


if __name__ == "__main__":
    B, S, ENC_HID = 2, 8, 16
    DEC_HID = ENC_HID            # bidirectional 'general' scoring: 2 * DEC == E2
    E2 = 2 * ENC_HID

    key = jax.random.PRNGKey(0)
    k1, k2, k3, k4 = jax.random.split(key, 4)

    bound = 1.0 / np.sqrt(E2)
    params = {
        'attn_w': jax.random.uniform(k1, (E2, E2), jnp.float32, -bound, bound),
        'attn_b': jax.random.uniform(k2, (E2,), jnp.float32, -bound, bound),
    }

    hidden = jax.random.normal(k3, (1, B, DEC_HID), jnp.float32)            # [1, B, D]
    encoder_outputs = jax.random.normal(k4, (S, B, E2), jnp.float32)        # [S, B, E2]
    lens = jnp.array([S, S - 3], dtype=jnp.int32)                           # padded seqs
    mask = (jnp.arange(S)[None, :] < lens[:, None]).astype(jnp.int32)       # [B, S]

    # jit so the wrapper-side transpose + bf16 cast + pad fuse into one pass.
    general_fn = jax.jit(functools.partial(luong_global_attention, method='general'))
    out = jax.block_until_ready(general_fn(hidden, encoder_outputs, None, params,
                                           lens=lens))

    # Reference sees the same bf16-quantized encoder activations the kernel reads.
    enc_q = encoder_outputs.astype(jnp.bfloat16).astype(jnp.float32)
    ref = luong_reference(hidden, enc_q, mask, params, method='general')
    np.testing.assert_allclose(np.asarray(out), np.asarray(ref), rtol=2e-4, atol=1e-5)

    # 'dot' scoring shares the same kernel (identity W, zero bias).
    dot_fn = jax.jit(functools.partial(luong_global_attention, method='dot'))
    out_dot = jax.block_until_ready(dot_fn(hidden, encoder_outputs, None, None,
                                           lens=lens))
    ref_dot = luong_reference(hidden, enc_q, mask, params, method='dot')
    np.testing.assert_allclose(np.asarray(out_dot), np.asarray(ref_dot),
                               rtol=2e-4, atol=1e-5)

    print("KERNEL_OK")
</pallas_src>

<mosaic_0001>
module attributes {stable_mosaic.version = 11 : i64} {
  func.func @kernel(%arg0: i32, %arg1: memref<8x32xf32, #tpu.memory_space<vmem>>, %arg2: memref<8x1xi32, #tpu.memory_space<vmem>>, %arg3: memref<8x32x128xbf16, #tpu.memory_space<vmem>>, %arg4: memref<32x32xf32, #tpu.memory_space<vmem>>, %arg5: memref<1x32xf32, #tpu.memory_space<vmem>>, %arg6: memref<8x128xf32, #tpu.memory_space<vmem>>) attributes {dimension_semantics = [#tpu.dimension_semantics<parallel>], iteration_bounds = array<i64: 1>, scalar_prefetch = 0 : i64, scratch_operands = 0 : i64, tpu.core_type = #tpu.core_type<tc>, window_params = [{transform_indices = @transform_0, window_bounds = array<i64: 8, 32>}, {transform_indices = @transform_1, window_bounds = array<i64: 8, 1>}, {transform_indices = @transform_2, window_bounds = array<i64: 8, 32, 128>}, {pipeline_mode = #tpu.pipeline_mode<synchronous>, transform_indices = @transform_3, window_bounds = array<i64: 32, 32>}, {pipeline_mode = #tpu.pipeline_mode<synchronous>, transform_indices = @transform_4, window_bounds = array<i64: 1, 32>}, {transform_indices = @transform_5, window_bounds = array<i64: 8, 128>}]} {
    %c0 = arith.constant 0 : index
    %c0_0 = arith.constant 0 : index
    %0 = vector.load %arg1[%c0, %c0_0] : memref<8x32xf32, #tpu.memory_space<vmem>>, vector<8x32xf32>
    %c0_1 = arith.constant 0 : index
    %c0_2 = arith.constant 0 : index
    %1 = vector.load %arg4[%c0_1, %c0_2] : memref<32x32xf32, #tpu.memory_space<vmem>>, vector<32x32xf32>
    %cst = arith.constant dense<0.000000e+00> : vector<8x32xf32>
    %2 = tpu.matmul %0, %1, %cst {dimension_numbers = #tpu.dot_dimension_numbers<[1], [0], [0], [1], [0, 0, 1, 1], [], []>} : vector<8x32xf32>, vector<32x32xf32>, vector<8x32xf32> -> vector<8x32xf32>
    %c0_3 = arith.constant 0 : index
    %c0_4 = arith.constant 0 : index
    %3 = vector.load %arg1[%c0_3, %c0_4] : memref<8x32xf32, #tpu.memory_space<vmem>>, vector<8x32xf32>
    %c0_5 = arith.constant 0 : index
    %c0_6 = arith.constant 0 : index
    %4 = vector.load %arg5[%c0_5, %c0_6] : memref<1x32xf32, #tpu.memory_space<vmem>>, vector<1x32xf32>
    %5 = vector.broadcast %4 : vector<1x32xf32> to vector<8x32xf32>
    %6 = arith.mulf %3, %5 : vector<8x32xf32>
    %cst_7 = arith.constant dense<0.000000e+00> : vector<8xf32>
    %7 = vector.multi_reduction <add>, %6, %cst_7 [1] : vector<8x32xf32> to vector<8xf32>
    %8 = vector.shape_cast %7 : vector<8xf32> to vector<8x1xf32>
    %c0_8 = arith.constant 0 : index
    %c0_9 = arith.constant 0 : index
    %c0_10 = arith.constant 0 : index
    %9 = vector.load %arg3[%c0_8, %c0_9, %c0_10] : memref<8x32x128xbf16, #tpu.memory_space<vmem>>, vector<8x16x128xbf16>
    %10 = arith.extf %9 : vector<8x16x128xbf16> to vector<8x16x128xf32>
    %11 = vector.extract_strided_slice %2 {offsets = [0, 0], sizes = [8, 16], strides = [1, 1]} : vector<8x32xf32> to vector<8x16xf32>
    %12 = vector.shape_cast %11 : vector<8x16xf32> to vector<8x16x1xf32>
    %13 = vector.broadcast %12 : vector<8x16x1xf32> to vector<8x16x128xf32>
    %14 = arith.mulf %10, %13 : vector<8x16x128xf32>
    %cst_11 = arith.constant dense<0.000000e+00> : vector<8x128xf32>
    %15 = vector.multi_reduction <add>, %14, %cst_11 [1] : vector<8x16x128xf32> to vector<8x128xf32>
    %c0_12 = arith.constant 0 : index
    %c16 = arith.constant 16 : index
    %c0_13 = arith.constant 0 : index
    %16 = vector.load %arg3[%c0_12, %c16, %c0_13] : memref<8x32x128xbf16, #tpu.memory_space<vmem>>, vector<8x16x128xbf16>
    %17 = arith.extf %16 : vector<8x16x128xbf16> to vector<8x16x128xf32>
    %18 = vector.extract_strided_slice %2 {offsets = [0, 16], sizes = [8, 16], strides = [1, 1]} : vector<8x32xf32> to vector<8x16xf32>
    %19 = vector.shape_cast %18 : vector<8x16xf32> to vector<8x16x1xf32>
    %20 = vector.broadcast %19 : vector<8x16x1xf32> to vector<8x16x128xf32>
    %21 = arith.mulf %17, %20 : vector<8x16x128xf32>
    %cst_14 = arith.constant dense<0.000000e+00> : vector<8x128xf32>
    %22 = vector.multi_reduction <add>, %21, %cst_14 [1] : vector<8x16x128xf32> to vector<8x128xf32>
    %23 = arith.addf %15, %22 : vector<8x128xf32>
    %24 = vector.broadcast %8 : vector<8x1xf32> to vector<8x128xf32>
    %25 = arith.addf %23, %24 : vector<8x128xf32>
    %26 = tpu.iota {dimensions = array<i32: 1>} : vector<8x128xi32>
    %c0_15 = arith.constant 0 : index
    %c0_16 = arith.constant 0 : index
    %27 = vector.load %arg2[%c0_15, %c0_16] : memref<8x1xi32, #tpu.memory_space<vmem>>, vector<8x1xi32>
    %28 = vector.broadcast %27 : vector<8x1xi32> to vector<8x128xi32>
    %29 = arith.cmpi slt, %26, %28 : vector<8x128xi32>
    %cst_17 = arith.constant -1.000000e+10 : f32
    %30 = vector.broadcast %cst_17 : f32 to vector<8x128xf32>
    %31 = arith.select %29, %25, %30 : vector<8x128xi1>, vector<8x128xf32>
    %cst_18 = arith.constant dense<0xFF800000> : vector<8xf32>
    %32 = vector.multi_reduction <maximumf>, %31, %cst_18 [1] : vector<8x128xf32> to vector<8xf32>
    %33 = vector.shape_cast %32 : vector<8xf32> to vector<8x1xf32>
    %34 = vector.broadcast %33 : vector<8x1xf32> to vector<8x128xf32>
    %35 = arith.subf %31, %34 : vector<8x128xf32>
    %36 = math.exp %35 : vector<8x128xf32>
    %c8_i32 = arith.constant 8 : i32
    %37 = vector.broadcast %c8_i32 : i32 to vector<8x128xi32>
    %38 = arith.cmpi slt, %26, %37 : vector<8x128xi32>
    %cst_19 = arith.constant 0.000000e+00 : f32
    %39 = vector.broadcast %cst_19 : f32 to vector<8x128xf32>
    %40 = arith.select %38, %36, %39 : vector<8x128xi1>, vector<8x128xf32>
    %cst_20 = arith.constant dense<0.000000e+00> : vector<8xf32>
    %41 = vector.multi_reduction <add>, %40, %cst_20 [1] : vector<8x128xf32> to vector<8xf32>
    %42 = vector.shape_cast %41 : vector<8xf32> to vector<8x1xf32>
    %43 = tpu.reciprocal %42 {approx = true} : vector<8x1xf32> -> vector<8x1xf32>
    %44 = arith.mulf %42, %43 : vector<8x1xf32>
    %cst_21 = arith.constant 2.000000e+00 : f32
    %45 = vector.broadcast %cst_21 : f32 to vector<8x1xf32>
    %46 = arith.subf %45, %44 : vector<8x1xf32>
    %47 = arith.mulf %43, %46 : vector<8x1xf32>
    %48 = vector.broadcast %47 : vector<8x1xf32> to vector<8x128xf32>
    %49 = arith.mulf %40, %48 : vector<8x128xf32>
    %c0_22 = arith.constant 0 : index
    %c0_23 = arith.constant 0 : index
    %50 = vector.load %arg6[%c0_22, %c0_23] : memref<8x128xf32, #tpu.memory_space<vmem>>, vector<8x128xf32>
    tpu.vector_store %arg6[%c0_22, %c0_23], %49 {strides = array<i32>} : memref<8x128xf32, #tpu.memory_space<vmem>>, vector<8x128xf32>,
    return
  }
  func.func @transform_0(%arg0: i32) -> (i32, i32) {
    %c0_i32 = arith.constant 0 : i32
    %c0_i32_0 = arith.constant 0 : i32
    return %arg0, %c0_i32 : i32, i32
  }
  func.func @transform_1(%arg0: i32) -> (i32, i32) {
    %c0_i32 = arith.constant 0 : i32
    %c0_i32_0 = arith.constant 0 : i32
    return %arg0, %c0_i32 : i32, i32
  }
  func.func @transform_2(%arg0: i32) -> (i32, i32, i32) {
    %c0_i32 = arith.constant 0 : i32
    %c0_i32_0 = arith.constant 0 : i32
    %c0_i32_1 = arith.constant 0 : i32
    return %arg0, %c0_i32, %c0_i32_0 : i32, i32, i32
  }
  func.func @transform_3(%arg0: i32) -> (i32, i32) {
    %c0_i32 = arith.constant 0 : i32
    %c0_i32_0 = arith.constant 0 : i32
    %c0_i32_1 = arith.constant 0 : i32
    return %c0_i32, %c0_i32_0 : i32, i32
  }
  func.func @transform_4(%arg0: i32) -> (i32, i32) {
    %c0_i32 = arith.constant 0 : i32
    %c0_i32_0 = arith.constant 0 : i32
    %c0_i32_1 = arith.constant 0 : i32
    return %c0_i32, %c0_i32_0 : i32, i32
  }
  func.func @transform_5(%arg0: i32) -> (i32, i32) {
    %c0_i32 = arith.constant 0 : i32
    %c0_i32_0 = arith.constant 0 : i32
    return %arg0, %c0_i32 : i32, i32
  }
}

</mosaic_0001>

<bundles_post_ra>
// kernel: tile.7
= control target key start
LH: loop header
LB: loop body
LE: loop exit
PB: predicated region body
PF: predicated region fallthrough
CT: control target
= control target key end

     0   :  { %s10_s10 = smov 3  ;;  %vm12_vm0 = vcmask 130048   ;;  %s29_s11 = smov 16   ;;  %vm19_vm1 = vcmask 261248   ;;  %s49_s0 = inlined_call_operand.vmem [shape: f32[2,2,16], index: 0, kind: input, shape index: {}]   ;;  %s50_s1 = inlined_call_operand.vmem [shape: f32[2,32], index: 1, kind: output, shape index: {}]  }
   0x1   :  { %v27_v0 = vld [vmem:[%s49_s0 + $0x2] sm:$0x3]  ;;  %v8_v1 = vld [vmem:[%s49_s0] sm:$0x3]  ;;  %s15_s0 = smov 3 }
   0x2   :  { %7 = vst [vmem:[#allocation1 + $0x8] sm:$0x3] %v27_v0 }
   0x3   :  { %9 = vst [vmem:[#allocation1] sm:$0x3] %v8_v1 }
   0xa   :  { %v16_v2 = vld [vmem:[#allocation1 + $0x1] ss:$8 sm:%s15_s0]   ;;  %v11_v3 = vld [vmem:[#allocation1] ss:$8 sm:%s10_s10]  }
   0xb   :  { %17 = vrot.lane.b32.xlu0 %v16_v2, %s29_s11  ;;  %13 = vst.msk [vmem:[#allocation0] sm:$0x3] %vm12_vm0, %v11_v3  }
  0x7d   :  { %v18_v4 = vpop.permute.xlu0 %17  }
  0x7e   :  { %20 = vst.msk [vmem:[#allocation0] sm:$0x3] %vm19_vm1, %v18_v4  }
  0x85   :  { %v23_v5 = vld [vmem:[#allocation0] sm:$0x3] }
  0x86   :  { %26 = vst [vmem:[%s50_s1] sm:$0x3] %v23_v5 }

// kernel: luong_global_attention.1
= control target key start
LH: loop header
LB: loop body
LE: loop exit
PB: predicated region body
PF: predicated region fallthrough
CT: control target
= control target key end

     0   :  { %v90_v0 = vlaneseq  ;;  %vm25_vm0 = vcmask 261120   ;;  %vm513_vm1 = vcmask 1041409   ;;  %vm516_vm2 = vcmask 1042434   ;;  %s848_s3 = inlined_call_operand.vmem [shape: f32[32,32], index: 3, kind: input, shape index: {}]   ;;  %s849_s4 = inlined_call_operand.vmem [shape: f32[1,32], index: 4, kind: input, shape index: {}]   ;;  %s850_s0 = inlined_call_operand.vmem [shape: f32[8,32], index: 0, kind: input, shape index: {}]   ;;  %s851_s2 = inlined_call_operand.vmem [shape: bf16[8,32,128], index: 2, kind: input, shape index: {}]   ;;  %s852_s1 = inlined_call_operand.vmem [shape: s32[8,1], index: 1, kind: input, shape index: {}]   ;;  %s853_s5 = inlined_call_operand.vmem [shape: f32[8,128], index: 5, kind: output, shape index: {}]  }
   0x1   :  { %v24_v1 = vld [vmem:[%s848_s3 + $0x18] sm:$0xff]  ;;  %v23_v2 = vld [vmem:[%s848_s3 + $0x10] sm:$0xff]  ;;  %v22_v4 = vld [vmem:[%s848_s3 + $0x8] sm:$0xff]  ;;  %vm519_vm3 = vcmask 1043459   ;;  %vm522_vm4 = vcmask 1044484   ;;  %vm525_vm5 = vcmask 1045509  }
   0x2   :  { %41 = vmatpush.msra.mxu0 %v24_v1  ;;  %v709_v3 = vshrl.u32 %v90_v0, 7  ;;  %v666_v5 = vld [vmem:[%s849_s4] ss:$0 sm:$0xff]  ;;  %v619_v24 = vld [vmem:[%s851_s2 + $0x10] sm:$0xff]   ;;  %v626_v48 = vld [vmem:[%s851_s2 + $0x8] sm:$0xff]   ;;  %vm528_vm6 = vcmask 1046534  }
   0x3   :  { %v20_v6 = vld [vmem:[%s850_s0] sm:$0xff]  ;;  %v562_v25 = vunpack.c.h.bf16 %v619_v24  ;;  %v561_v26 = vunpack.c.l.bf16 %v619_v24  ;;  %v590_v50 = vunpack.c.h.bf16 %v626_v48  ;;  %v589_v51 = vunpack.c.l.bf16 %v626_v48  ;;  %v627_v58 = vld [vmem:[%s851_s2 + $0x18] sm:$0xff]  }
   0x4   :  { %42 = vmatpush.msra.mxu0 %v23_v2  ;;  %635 = vset.pattern.permute.xlu0 %v709_v3  ;;  %v722_v7 = vadd.s32 8, %v709_v3  ;;  %v21_v8 = vld [vmem:[%s848_s3] sm:$0xff]  ;;  %v53_v9 = vmul.f32 %v666_v5, %v20_v6  ;;  %v734_v14 = vadd.s32 24, %v709_v3  ;;  %v741_v16 = vadd.s32 16, %v709_v3 }
   0x5   :  { %v620_v34 = vld [vmem:[%s851_s2 + $0x20] sm:$0xff]   ;;  %v594_v61 = vunpack.c.h.bf16 %v627_v58  ;;  %v593_v63 = vunpack.c.l.bf16 %v627_v58  ;;  %vm531_vm7 = vcmask 1047559  }
   0x6   :  { %43 = vmatpush.msra.mxu0 %v22_v4  ;;  %638 = vset.pattern.permute.xlu2 %v722_v7  ;;  %v54_v10 = vsel %vm25_vm0, %v53_v9, 0.0  ;;  %v556_v35 = vld [vmem:[%s851_s2] sm:$0xff]   ;;  %v565_v37 = vunpack.c.l.bf16 %v620_v34  ;;  %v566_v38 = vunpack.c.h.bf16 %v620_v34 }
   0x7   :  { %636 = vset.pattern.permute.xlu1 %v722_v7  ;;  %55 = vadd.xlane.f32.xlu0 %v54_v10  ;;  %v558_v39 = vunpack.c.h.bf16 %v556_v35  ;;  %v557_v40 = vunpack.c.l.bf16 %v556_v35  ;;  %v628_v10 = vld [vmem:[%s851_s2 + $0x28] sm:$0xff]  }
   0x8   :  { %44 = vmatpush.msra.mxu0 %v21_v8 }
   0x9   :  { %554 = vmatmul.msk.f32.vlgmr.msra.gmra.mxu0 %vm25_vm0, %v20_v6 }
  0x7a   :  { %v771_v32 = vpop.xlane.xlu0 %55 }
  0x86   :  { %v729_v11 = vpop.f32.mrf.mxu0 }
  0x87   :  { %v102_v12 = vperm.slane %v729_v11, 1  ;;  %v89_v13 = vperm.slane %v729_v11, 0  ;;  %v115_v15 = vperm.slane %v729_v11, 2  ;;  %v128_v17 = vperm.slane %v729_v11, 3 }
  0x88   :  { %v141_v18 = vperm.slane %v729_v11, 4  ;;  %v154_v19 = vperm.slane %v729_v11, 5  ;;  %v754_v20 = vperm.slane %v729_v11, 7  ;;  %v167_v36 = vperm.slane %v729_v11, 6 }
  0x89   :  { %113 = vperm.xlu2 %638, %v102_v12   ;;  %100 = vperm.xlu1 %636, %v89_v13  }
  0x8a   :  { %94 = vperm.xlu0 %635, %v89_v13  }
  0x91   :  { %639 = vset.pattern.permute.xlu2 %v709_v3  ;;  %637 = vset.pattern.permute.xlu1 %v709_v3 }
  0x92   :  { %645 = vset.pattern.permute.xlu0 %v734_v14 }
  0x99   :  { %120 = vperm.xlu2 %639, %v115_v15   ;;  %107 = vperm.xlu1 %637, %v102_v12  }
  0x9a   :  { %307 = vperm.xlu0 %645, %v89_v13  }
  0xa1   :  { %133 = vperm.xlu2 %639, %v128_v17   ;;  %640 = vset.pattern.permute.xlu1 %v722_v7 }
  0xa2   :  { %650 = vset.pattern.permute.xlu0 %v741_v16 }
  0xa9   :  { %642 = vset.pattern.permute.xlu2 %v734_v14  ;;  %126 = vperm.xlu1 %640, %v115_v15  }
  0xaa   :  { %349 = vperm.xlu0 %650, %v141_v18  }
  0xb1   :  { %319 = vperm.xlu2 %642, %v102_v12   ;;  %641 = vset.pattern.permute.xlu1 %v741_v16 }
  0xb2   :  { %655 = vset.pattern.permute.xlu0 %v734_v14 }
  0xb9   :  { %331 = vperm.xlu2 %642, %v115_v15   ;;  %313 = vperm.xlu1 %641, %v102_v12  }
  0xba   :  { %367 = vperm.xlu0 %655, %v154_v19  }
  0xc1   :  { %644 = vset.pattern.permute.xlu2 %v741_v16  ;;  %325 = vperm.xlu1 %641, %v115_v15   ;;  %v598_v15 = vunpack.c.h.bf16 %v628_v10 }
  0xc2   :  { %660 = vset.pattern.permute.xlu0 %v709_v3 }
  0xc9   :  { %301 = vperm.xlu2 %644, %v89_v13   ;;  %643 = vset.pattern.permute.xlu1 %v722_v7 }
  0xca   :  { %185 = vperm.xlu0 %660, %v754_v20  }
  0xd1   :  { %647 = vset.pattern.permute.xlu2 %v734_v14  ;;  %139 = vperm.xlu1 %643, %v128_v17  }
  0xd9   :  { %343 = vperm.xlu2 %647, %v128_v17   ;;  %646 = vset.pattern.permute.xlu1 %v741_v16 }
  0xe1   :  { %649 = vset.pattern.permute.xlu2 %v722_v7  ;;  %337 = vperm.xlu1 %646, %v128_v17  }
  0xe3   :  { %v114_v21 = vpop.permute.xlu2 %113 }
  0xe4   :  { %v196_v29 = vmul.f32 %v562_v25, %v114_v21 }
  0xe9   :  { %152 = vperm.xlu2 %649, %v141_v18   ;;  %648 = vset.pattern.permute.xlu1 %v709_v3 }
  0xf1   :  { %652 = vset.pattern.permute.xlu2 %v709_v3  ;;  %146 = vperm.xlu1 %648, %v141_v18  }
  0xf3   :  { %v121_v22 = vpop.permute.xlu2 %120 }
  0xf4   :  { %v197_v44 = vmul.f32 %v565_v37, %v121_v22 }
  0xf9   :  { %159 = vperm.xlu2 %652, %v154_v19   ;;  %651 = vset.pattern.permute.xlu1 %v734_v14 }
  0xfb   :  { %v101_v23 = vpop.permute.xlu1 %100  ;;  %v768_v27 = vpop.permute.xlu2 %133 }
  0xfc   :  { %v95_v41 = vpop.permute.xlu0 %94  ;;  %v194_v46 = vmul.f32 %v558_v39, %v101_v23 }
  0xfd   :  { %v193_v47 = vmul.f32 %v557_v40, %v95_v41 }
  0xff   :  { %v209_v52 = vadd.f32 %v194_v46, %v193_v47 }
 0x101   :  { %654 = vset.pattern.permute.xlu2 %v741_v16  ;;  %355 = vperm.xlu1 %651, %v141_v18   ;;  %v210_v57 = vrot.slane %v209_v52, 4 }
 0x103   :  { %v211_v1 = vadd.f32 %v210_v57, %v209_v52 }
 0x105   :  { %v212_v9 = vrot.slane %v211_v1, 2 }
 0x107   :  { %v213_v21 = vadd.f32 %v212_v9, %v211_v1 }
 0x109   :  { %361 = vperm.xlu2 %654, %v154_v19   ;;  %653 = vset.pattern.permute.xlu1 %v722_v7 }
 0x10b   :  { %v108_v28 = vpop.permute.xlu1 %107  ;;  %v320_v33 = vpop.permute.xlu2 %319 }
 0x10c   :  { %v195_v30 = vmul.f32 %v561_v26, %v108_v28  ;;  %v308_v53 = vpop.permute.xlu0 %307  ;;  %v396_v5 = vmul.f32 %v594_v61, %v320_v33 }
 0x10d   :  { %v394_v55 = vmul.f32 %v590_v50, %v308_v53 }
 0x10e   :  { %v216_v31 = vadd.f32 %v196_v29, %v195_v30 }
 0x110   :  { %v217_v59 = vrot.slane %v216_v31, 4 }
 0x111   :  { %657 = vset.pattern.permute.xlu2 %v722_v7  ;;  %165 = vperm.xlu1 %653, %v154_v19   ;;  %v597_v19 = vunpack.c.l.bf16 %v628_v10 }
 0x112   :  { %v218_v2 = vadd.f32 %v217_v59, %v216_v31  ;;  %v214_v31 = vrot.slane %v213_v21, 1 }
 0x113   :  { %v332_v42 = vpop.permute.xlu2 %331 }
 0x114   :  { %v219_v11 = vrot.slane %v218_v2, 2  ;;  %v398_v26 = vmul.f32 %v598_v15, %v332_v42  ;;  %v215_v41 = vadd.f32 %v214_v31, %v213_v21 }
 0x116   :  { %v220_v22 = vadd.f32 %v219_v11, %v218_v2 }
 0x118   :  { %v221_v33 = vrot.slane %v220_v22, 1 }
 0x119   :  { %178 = vperm.xlu2 %657, %v167_v36   ;;  %656 = vset.pattern.permute.xlu1 %v709_v3 }
 0x11b   :  { %v127_v43 = vpop.permute.xlu1 %126 }
 0x11c   :  { %v198_v45 = vmul.f32 %v566_v38, %v127_v43 }
 0x11e   :  { %v223_v49 = vadd.f32 %v198_v45, %v197_v44 }
 0x120   :  { %v224_v12 = vrot.slane %v223_v49, 4 }
 0x121   :  { %659 = vset.pattern.permute.xlu2 %v734_v14  ;;  %172 = vperm.xlu1 %656, %v167_v36  }
 0x122   :  { %v225_v23 = vadd.f32 %v224_v12, %v223_v49 }
 0x123   :  { %v302_v54 = vpop.permute.xlu2 %301 }
 0x124   :  { %v393_v56 = vmul.f32 %v589_v51, %v302_v54  ;;  %v226_v34 = vrot.slane %v225_v23, 2  ;;  %v621_v54 = vld [vmem:[%s851_s2 + $0x30] sm:$0xff]  }
 0x125   :  { %v570_v57 = vunpack.c.h.bf16 %v621_v54 }
 0x126   :  { %v409_v60 = vadd.f32 %v394_v55, %v393_v56  ;;  %v227_v42 = vadd.f32 %v226_v34, %v225_v23 }
 0x128   :  { %v410_v62 = vrot.slane %v409_v60, 4  ;;  %v228_v48 = vrot.slane %v227_v42, 1 }
 0x129   :  { %379 = vperm.xlu2 %659, %v167_v36   ;;  %658 = vset.pattern.permute.xlu1 %v741_v16 }
 0x12a   :  { %v411_v3 = vadd.f32 %v410_v62, %v409_v60  ;;  %v229_v55 = vadd.f32 %v228_v48, %v227_v42  ;;  %v569_v60 = vunpack.c.l.bf16 %v621_v54  ;;  %v350_v42 = vpop.permute.xlu0 %349 }
 0x12b   :  { %v314_v4 = vpop.permute.xlu1 %313 }
 0x12c   :  { %v412_v6 = vrot.slane %v411_v3, 2  ;;  %v395_v8 = vmul.f32 %v593_v63, %v314_v4  ;;  %v199_v1 = vmul.f32 %v569_v60, %v768_v27 }
 0x12e   :  { %v416_v13 = vadd.f32 %v396_v5, %v395_v8  ;;  %v413_v17 = vadd.f32 %v412_v6, %v411_v3  ;;  %v629_v5 = vld [vmem:[%s851_s2 + $0x38] sm:$0xff]  }
 0x12f   :  { %v602_v8 = vunpack.c.h.bf16 %v629_v5  ;;  %v601_v9 = vunpack.c.l.bf16 %v629_v5 }
 0x130   :  { %v417_v18 = vrot.slane %v416_v13, 4  ;;  %v414_v28 = vrot.slane %v413_v17, 1 }
 0x131   :  { %662 = vset.pattern.permute.xlu2 %v741_v16  ;;  %373 = vperm.xlu1 %658, %v167_v36   ;;  %v474_v16 = vrot.slane %v771_v32, 1  ;;  %v222_v36 = vadd.f32 %v221_v33, %v220_v22 }
 0x132   :  { %v418_v24 = vadd.f32 %v417_v18, %v416_v13  ;;  %v415_v38 = vadd.f32 %v414_v28, %v413_v17  ;;  %v476_v28 = vrot.slane %v771_v32, 3 }
 0x133   :  { %v326_v25 = vpop.permute.xlu1 %325  ;;  %v344_v10 = vpop.permute.xlu2 %343 }
 0x134   :  { %v419_v29 = vrot.slane %v418_v24, 2  ;;  %v397_v30 = vmul.f32 %v597_v19, %v326_v25  ;;  %v465_v45 = vadd.f32 %v415_v38, %v215_v41  ;;  %v400_v13 = vmul.f32 %v602_v8, %v344_v10  ;;  %v499_v25 = vld [vmem:[%s852_s1] sm:$0xff] }
 0x136   :  { %v420_v35 = vadd.f32 %v419_v29, %v418_v24  ;;  %v423_v37 = vadd.f32 %v398_v26, %v397_v30  ;;  %v489_v51 = vadd.f32 %v465_v45, %v771_v32  ;;  %v671_v24 = vmov 0  }
 0x137   :  { %665 = vset.pattern.permute.xlu0 %v671_v24 }
 0x138   :  { %v421_v39 = vrot.slane %v420_v35, 1  ;;  %v424_v40 = vrot.slane %v423_v37, 4 }
 0x139   :  { %385 = vperm.xlu2 %662, %v754_v20   ;;  %661 = vset.pattern.permute.xlu1 %v722_v7  ;;  %v475_v7 = vrot.slane %v771_v32, 2 }
 0x13a   :  { %v422_v43 = vadd.f32 %v421_v39, %v420_v35  ;;  %v425_v44 = vadd.f32 %v424_v40, %v423_v37 }
 0x13c   :  { %v466_v46 = vadd.f32 %v422_v43, %v222_v36  ;;  %v426_v47 = vrot.slane %v425_v44, 2  ;;  %v630_v43 = vld [vmem:[%s851_s2 + $0x48] sm:$0xff]  }
 0x13d   :  { %v606_v45 = vunpack.c.h.bf16 %v630_v43 }
 0x13e   :  { %v490_v49 = vadd.f32 %v474_v16, %v466_v46  ;;  %v427_v50 = vadd.f32 %v426_v47, %v425_v44  ;;  %v623_v44 = vld [vmem:[%s851_s2 + $0x50] sm:$0xff]   ;;  %v622_v46 = vld [vmem:[%s851_s2 + $0x40] sm:$0xff]   ;;  %v632_v47 = vld [vmem:[%s851_s2 + $0x68] sm:$0xff]  }
 0x13f   :  { %v578_v48 = vunpack.c.h.bf16 %v623_v44 }
 0x140   :  { %v512_v52 = vrot.slane %v490_v49, 7  ;;  %v428_v53 = vrot.slane %v427_v50, 1  ;;  %v605_v49 = vunpack.c.l.bf16 %v630_v43 }
 0x141   :  { %191 = vperm.xlu1 %661, %v754_v20   ;;  %664 = vset.pattern.permute.xlu2 %v671_v24 }
 0x142   :  { %v429_v56 = vadd.f32 %v428_v53, %v427_v50  ;;  %v514_v58 = vsel %vm513_vm1, %v512_v52, %v489_v51  ;;  %501 = vperm.xlu2 %664, %v499_v25   ;;  %v631_v50 = vld [vmem:[%s851_s2 + $0x58] sm:$0xff]   ;;  %v573_v51 = vunpack.c.l.bf16 %v622_v46  ;;  %v613_v52 = vunpack.c.l.bf16 %v632_v47 }
 0x143   :  { %v140_v59 = vpop.permute.xlu1 %139  ;;  %v153_v37 = vpop.permute.xlu2 %152  ;;  %v577_v53 = vunpack.c.l.bf16 %v623_v44  ;;  %v609_v54 = vunpack.c.l.bf16 %v631_v50  ;;  %v610_v60 = vunpack.c.h.bf16 %v631_v50  ;;  %v633_v44 = vld [vmem:[%s851_s2 + $0x78] sm:$0xff]  }
 0x144   :  { %v467_v61 = vadd.f32 %v429_v56, %v229_v55  ;;  %v200_v63 = vmul.f32 %v570_v57, %v140_v59  ;;  %v574_v56 = vunpack.c.h.bf16 %v622_v46 }
 0x146   :  { %v491_v62 = vadd.f32 %v475_v7, %v467_v61  ;;  %v230_v3 = vadd.f32 %v200_v63, %v199_v1  ;;  %v624_v7 = vld [vmem:[%s851_s2 + $0x60] sm:$0xff]   ;;  %v401_v63 = vmul.f32 %v605_v49, %v350_v42  ;;  %v368_v1 = vpop.permute.xlu0 %367  ;;  %v202_v8 = vmul.f32 %v574_v56, %v153_v37 }
 0x147   :  { %v581_v59 = vunpack.c.l.bf16 %v624_v7 }
 0x148   :  { %v515_v2 = vrot.slane %v491_v62, 6  ;;  %v231_v6 = vrot.slane %v230_v3, 4 }
 0x149   :  { %663 = vset.pattern.permute.xlu1 %v734_v14 }
 0x14a   :  { %v517_v4 = vsel %vm516_vm2, %v515_v2, %v514_v58  ;;  %v232_v11 = vadd.f32 %v231_v6, %v230_v3  ;;  %v614_v58 = vunpack.c.h.bf16 %v632_v47  ;;  %v582_v3 = vunpack.c.h.bf16 %v624_v7 }
 0x14c   :  { %v233_v27 = vrot.slane %v232_v11, 2 }
 0x14e   :  { %v234_v14 = vadd.f32 %v233_v27, %v232_v11 }
 0x150   :  { %v235_v22 = vrot.slane %v234_v14, 1 }
 0x151   :  { %391 = vperm.xlu1 %663, %v754_v20  }
 0x152   :  { %v236_v26 = vadd.f32 %v235_v22, %v234_v14 }
 0x153   :  { %v338_v12 = vpop.permute.xlu1 %337  ;;  %v160_v39 = vpop.permute.xlu2 %159 }
 0x154   :  { %v399_v15 = vmul.f32 %v601_v9, %v338_v12  ;;  %v203_v5 = vmul.f32 %v577_v53, %v160_v39  ;;  %v404_v12 = vmul.f32 %v610_v60, %v368_v1 }
 0x156   :  { %v430_v17 = vadd.f32 %v400_v13, %v399_v15  ;;  %v625_v15 = vld [vmem:[%s851_s2 + $0x70] sm:$0xff]  }
 0x157   :  { %v585_v24 = vunpack.c.l.bf16 %v625_v15 }
 0x158   :  { %v431_v18 = vrot.slane %v430_v17, 4 }
 0x15a   :  { %v432_v19 = vadd.f32 %v431_v18, %v430_v17 }
 0x15c   :  { %v433_v21 = vrot.slane %v432_v19, 2 }
 0x15e   :  { %v434_v23 = vadd.f32 %v433_v21, %v432_v19  ;;  %v586_v19 = vunpack.c.h.bf16 %v625_v15 }
 0x160   :  { %v435_v20 = vrot.slane %v434_v23, 1 }
 0x162   :  { %v436_v29 = vadd.f32 %v435_v20, %v434_v23  ;;  %v186_v20 = vpop.permute.xlu0 %185 }
 0x163   :  { %v147_v35 = vpop.permute.xlu1 %146  ;;  %v362_v41 = vpop.permute.xlu2 %361 }
 0x164   :  { %v468_v30 = vadd.f32 %v436_v29, %v236_v26  ;;  %v201_v2 = vmul.f32 %v573_v51, %v147_v35  ;;  %v403_v6 = vmul.f32 %v609_v54, %v362_v41  ;;  %v207_v35 = vmul.f32 %v585_v24, %v186_v20 }
 0x165   :  { %v617_v51 = vunpack.c.l.bf16 %v633_v44  ;;  %v478_v24 = vrot.slane %v771_v32, 5  ;;  %v479_v20 = vrot.slane %v771_v32, 6 }
 0x166   :  { %v492_v31 = vadd.f32 %v476_v28, %v468_v30  ;;  %v237_v27 = vadd.f32 %v202_v8, %v201_v2  ;;  %v444_v14 = vadd.f32 %v404_v12, %v403_v6 }
 0x168   :  { %v518_v33 = vrot.slane %v492_v31, 5  ;;  %v238_v26 = vrot.slane %v237_v27, 4  ;;  %v445_v29 = vrot.slane %v444_v14, 4 }
 0x16a   :  { %v813_v34 = vsel %vm519_vm3, %v518_v33, %v517_v4 }
 0x173   :  { %v356_v38 = vpop.permute.xlu1 %355  ;;  %v179_v36 = vpop.permute.xlu2 %178 }
 0x174   :  { %v402_v57 = vmul.f32 %v606_v45, %v356_v38  ;;  %v206_v17 = vmul.f32 %v582_v3, %v179_v36  ;;  %v239_v38 = vadd.f32 %v238_v26, %v237_v27 }
 0x176   :  { %v437_v9 = vadd.f32 %v402_v57, %v401_v63  ;;  %v240_v43 = vrot.slane %v239_v38, 2 }
 0x178   :  { %v438_v21 = vrot.slane %v437_v9, 4  ;;  %v241_v53 = vadd.f32 %v240_v43, %v239_v38 }
 0x17a   :  { %v439_v31 = vadd.f32 %v438_v21, %v437_v9  ;;  %v242_v63 = vrot.slane %v241_v53, 1 }
 0x183   :  { %v166_v40 = vpop.permute.xlu1 %165  ;;  %v380_v61 = vpop.permute.xlu2 %379 }
 0x184   :  { %v204_v62 = vmul.f32 %v578_v48, %v166_v40  ;;  %v406_v10 = vmul.f32 %v614_v58, %v380_v61  ;;  %v446_v40 = vadd.f32 %v445_v29, %v444_v14 }
 0x186   :  { %v244_v13 = vadd.f32 %v204_v62, %v203_v5  ;;  %v447_v46 = vrot.slane %v446_v40, 2 }
 0x188   :  { %v245_v25 = vrot.slane %v244_v13, 4 }
 0x18a   :  { %v246_v37 = vadd.f32 %v245_v25, %v244_v13 }
 0x18c   :  { %v247_v42 = vrot.slane %v246_v37, 2 }
 0x18e   :  { %v248_v50 = vadd.f32 %v247_v42, %v246_v37  ;;  %v498_v37 = vand.u32 127, %v90_v0 }
 0x190   :  { %v249_v60 = vrot.slane %v248_v50, 1  ;;  %vm540_vm9 = vcmp.lt.s32.totalorder %v498_v37, 8 }
 0x192   :  { %v250_v8 = vadd.f32 %v249_v60, %v248_v50 }
 0x193   :  { %v173_v16 = vpop.permute.xlu1 %172  ;;  %v386_v54 = vpop.permute.xlu2 %385 }
 0x194   :  { %v205_v11 = vmul.f32 %v581_v59, %v173_v16  ;;  %v440_v16 = vrot.slane %v439_v31, 2  ;;  %v407_v61 = vmul.f32 %v617_v51, %v386_v54 }
 0x196   :  { %v251_v22 = vadd.f32 %v206_v17, %v205_v11  ;;  %v441_v48 = vadd.f32 %v440_v16, %v439_v31 }
 0x198   :  { %v252_v33 = vrot.slane %v251_v22, 4  ;;  %v442_v57 = vrot.slane %v441_v48, 1 }
 0x19a   :  { %v253_v36 = vadd.f32 %v252_v33, %v251_v22  ;;  %v443_v5 = vadd.f32 %v442_v57, %v441_v48  ;;  %v480_v33 = vrot.slane %v771_v32, 7 }
 0x19c   :  { %v254_v49 = vrot.slane %v253_v36, 2 }
 0x19e   :  { %v255_v58 = vadd.f32 %v254_v49, %v253_v36 }
 0x1a0   :  { %v256_v6 = vrot.slane %v255_v58, 1 }
 0x1a2   :  { %v257_v17 = vadd.f32 %v256_v6, %v255_v58 }
 0x1a3   :  { %v374_v55 = vpop.permute.xlu1 %373 }
 0x1a4   :  { %v405_v4 = vmul.f32 %v613_v52, %v374_v55  ;;  %v618_v52 = vunpack.c.h.bf16 %v633_v44  ;;  %v448_v55 = vadd.f32 %v447_v46, %v446_v40  ;;  %v502_v40 = vpop.permute.xlu2 %501 }
 0x1a5   :  { %vm503_vm8 = vcmp.lt.s32.totalorder %v498_v37, %v502_v40 }
 0x1a6   :  { %v451_v18 = vadd.f32 %v406_v10, %v405_v4  ;;  %v449_v2 = vrot.slane %v448_v55, 1  ;;  %v243_v10 = vadd.f32 %v242_v63, %v241_v53 }
 0x1a8   :  { %v452_v28 = vrot.slane %v451_v18, 4  ;;  %v450_v12 = vadd.f32 %v449_v2, %v448_v55  ;;  %v469_v27 = vadd.f32 %v443_v5, %v243_v10 }
 0x1aa   :  { %v453_v39 = vadd.f32 %v452_v28, %v451_v18  ;;  %v470_v18 = vadd.f32 %v450_v12, %v250_v8 }
 0x1ac   :  { %v454_v45 = vrot.slane %v453_v39, 2  ;;  %v494_v28 = vadd.f32 %v478_v24, %v470_v18 }
 0x1ae   :  { %v455_v7 = vadd.f32 %v454_v45, %v453_v39  ;;  %v524_v39 = vrot.slane %v494_v28, 3 }
 0x1b0   :  { %v456_v1 = vrot.slane %v455_v7, 1 }
 0x1b2   :  { %v457_v11 = vadd.f32 %v456_v1, %v455_v7 }
 0x1b3   :  { %v192_v23 = vpop.permute.xlu1 %191 }
 0x1b4   :  { %v208_v30 = vmul.f32 %v586_v19, %v192_v23  ;;  %v477_v19 = vrot.slane %v771_v32, 4  ;;  %v471_v21 = vadd.f32 %v457_v11, %v257_v17 }
 0x1b6   :  { %v258_v41 = vadd.f32 %v208_v30, %v207_v35  ;;  %v493_v25 = vadd.f32 %v477_v19, %v469_v27  ;;  %v495_v29 = vadd.f32 %v479_v20, %v471_v21 }
 0x1b8   :  { %v259_v47 = vrot.slane %v258_v41, 4  ;;  %v521_v35 = vrot.slane %v493_v25, 4 }
 0x1ba   :  { %v260_v56 = vadd.f32 %v259_v47, %v258_v41  ;;  %v527_v41 = vrot.slane %v495_v29, 2  ;;  %v523_v36 = vsel %vm522_vm4, %v521_v35, %v813_v34 }
 0x1bb   :  { %v526_v42 = vsel %vm525_vm5, %v524_v39, %v523_v36 }
 0x1bc   :  { %v261_v3 = vrot.slane %v260_v56, 2  ;;  %v529_v44 = vsel %vm528_vm6, %v527_v41, %v526_v42 }
 0x1be   :  { %v262_v13 = vadd.f32 %v261_v3, %v260_v56 }
 0x1c0   :  { %v263_v22 = vrot.slane %v262_v13, 1 }
 0x1c2   :  { %v264_v30 = vadd.f32 %v263_v22, %v262_v13 }
 0x1c3   :  { %v392_v59 = vpop.permute.xlu1 %391 }
 0x1c4   :  { %v408_v62 = vmul.f32 %v618_v52, %v392_v59 }
 0x1c6   :  { %v458_v4 = vadd.f32 %v408_v62, %v407_v61 }
 0x1c8   :  { %v459_v9 = vrot.slane %v458_v4, 4 }
 0x1ca   :  { %v460_v15 = vadd.f32 %v459_v9, %v458_v4 }
 0x1cc   :  { %v461_v14 = vrot.slane %v460_v15, 2 }
 0x1ce   :  { %v462_v23 = vadd.f32 %v461_v14, %v460_v15 }
 0x1d0   :  { %v463_v26 = vrot.slane %v462_v23, 1 }
 0x1d2   :  { %v464_v31 = vadd.f32 %v463_v26, %v462_v23 }
 0x1d4   :  { %v472_v38 = vadd.f32 %v464_v31, %v264_v30 }
 0x1d6   :  { %v496_v16 = vadd.f32 %v480_v33, %v472_v38 }
 0x1d8   :  { %v530_v43 = vrot.slane %v496_v16, 1 }
 0x1da   :  { %v532_v45 = vsel %vm531_vm7, %v530_v43, %v529_v44 }
 0x1db   :  { %v534_v32 = vsel %vm503_vm8, %v532_v45, -1e+10 }
 0x1dc   :  { %535 = vmax.xlane.f32.xlu0 %v534_v32 }
 0x24f   :  { %v536_v46 = vpop.xlane.xlu0 %535 }
 0x250   :  { %v537_v0 = vsub.f32 %v534_v32, %v536_v46 }
 0x252   :  { %v538_v47 = vmul.f32 1.442695, %v537_v0 }
 0x254   :  { %667 = vpow2.f32 %v538_v47 }
 0x25a   :  { %v668_v48 = vpop.eup %667 }
 0x25b   :  { %v541_v49 = vsel %vm540_vm9, %v668_v48, 0.0 }
 0x25c   :  { %542 = vadd.xlane.f32.xlu1 %v541_v49 }
 0x2cf   :  { %v543_v50 = vpop.xlane.xlu1 %542 }
 0x2d0   :  { %669 = vrcp.f32 %v543_v50 }
 0x2d6   :  { %v670_v51 = vpop.eup %669 }
 0x2d7   :  { %v545_v34 = vmul.f32 %v670_v51, %v543_v50 }
 0x2d9   :  { %v546_v52 = vsub.f32 2.0, %v545_v34 }
 0x2db   :  { %v547_v53 = vmul.f32 %v670_v51, %v546_v52 }
 0x2dd   :  { %v548_v54 = vmul.f32 %v547_v53, %v541_v49 }
 0x2df   :  { %549 = vst [vmem:[%s853_s5] sm:$0xff] %v548_v54 }

</bundles_post_ra>
